<compile_context>
chip_gen: v7x
topology: tpu7x:2x2x1
jax: 0.10.0
libtpu: 0.0.40
codegen_flags: <defaults>
</compile_context>

<pallas_src>
import numpy as np
import jax
import jax.numpy as jnp
from jax.experimental import pallas as pl
from jax.experimental.pallas import tpu as pltpu

# Hyperparameters (module-level globals in the original TextCNN_code.py).
vocab_size = 16
embedding_size = 16
sequence_length = 8
num_classes = 4
filter_sizes = [2, 3, 4]
num_filters = 8
num_filters_total = num_filters * len(filter_sizes)
batch_size = 2

FS_MAX = max(filter_sizes)
LANES = 128


def _round_up(x, m):
    return ((x + m - 1) // m) * m


def textcnn_pallas(X, params):
    B = X.shape[0]
    S, E, V = sequence_length, embedding_size, vocab_size
    F, FT, C = num_filters, num_filters_total, num_classes
    KV = FS_MAX * V                     # combined (offset k, vocab v) code space
    N = B * S                           # conv rows (flattened batch*time)
    R = _round_up(N, 8)                 # sublane-padded row count

    # ---------------- host-side packing (layout plumbing only) ----------------
    # 1) Window codes: codes[r, k] = k*V + id(flat token r+k); sentinel KV for
    #    positions past the token stream / pad rows (never matches any lane).
    ids_flat = X.reshape(N).astype(jnp.int32)
    ids_pad = jnp.concatenate(
        [ids_flat, jnp.full((R + FS_MAX - 1 - N,), -1, jnp.int32)])
    codes = jnp.stack(
        [jnp.where(ids_pad[k:k + R] >= 0, ids_pad[k:k + R] + k * V, KV)
         for k in range(FS_MAX)], axis=1)                          # (R, FS_MAX) i32

    # 2) Conv weights packed over (offset k, emb e) with zero rows for k >= fs
    #    of each group, then the embedding matrix folded in:
    #    W_comb[k*V + v, j] = sum_e W_emb[v, e] * w_conv[k*E + e, j].
    blocks = []
    for i, fs in enumerate(filter_sizes):
        w = params['conv_w'][i][:, 0]                              # (F, fs, E)
        w = jnp.transpose(w, (1, 2, 0)).reshape(fs * E, F)         # (fs*E, F)
        w = jnp.pad(w, ((0, (FS_MAX - fs) * E), (0, 0)))
        blocks.append(w)
    w_conv = jnp.concatenate(blocks, axis=1).astype(jnp.float32)   # (FS_MAX*E, FT)
    w_emb = params['W_emb'].astype(jnp.float32)                    # (V, E)
    w_comb = jnp.concatenate(
        [jnp.dot(w_emb, w_conv[k * E:(k + 1) * E, :],
                 precision=jax.lax.Precision.HIGHEST)
         for k in range(FS_MAX)], axis=0)                          # (KV, FT)

    # 3) Trace-time constant additive time-validity mask, pre-tiled to (N, FT)
    #    so the kernel applies it with a single vadd.
    mask_np = np.zeros((S, FT), np.float32)
    for i, fs in enumerate(filter_sizes):
        assert S >= fs, "every filter size needs at least one valid timestep"
        mask_np[S - fs + 1:, i * F:(i + 1) * F] = -1e30
    mask_np = np.tile(mask_np, (B, 1))                             # (N, FT)

    # 4) One lane-dense packed parameter slab -> a single input DMA.
    r_wcomb = 0
    r_mask = _round_up(r_wcomb + KV, 8)
    r_bias = _round_up(r_mask + N, 8)   # row 0: conv bias, row 1: linear bias
    r_wlin = r_bias + 8
    n_rows = _round_up(r_wlin + FT, 8)

    b_conv = jnp.concatenate(
        [b.reshape(F) for b in params['conv_b']]).astype(jnp.float32)  # (FT,)
    packed = jnp.zeros((n_rows, LANES), jnp.float32)
    packed = packed.at[r_wcomb:r_wcomb + KV, :FT].set(w_comb)
    packed = packed.at[r_mask:r_mask + N, :FT].set(jnp.asarray(mask_np))
    packed = packed.at[r_bias, :FT].set(b_conv)
    packed = packed.at[r_bias + 1, :C].set(params['bias'].astype(jnp.float32))
    packed = packed.at[r_wlin:r_wlin + FT, :C].set(
        params['lin_w'].T.astype(jnp.float32))                    # (FT, C) block

    # ---------------- kernel ----------------
    def kernel(codes_ref, p_ref, out_ref):
        # Shifted one-hot slab straight from the window codes (no gather, no
        # unaligned sublane slices): slab[r, k*V+v] = [token at r+k has id v].
        codes_v = codes_ref[...]                                   # (R, FS_MAX)
        lane = jax.lax.broadcasted_iota(jnp.int32, (R, KV), 1)
        hit = codes_v[:, 0:1] == lane
        for k in range(1, FS_MAX):                                 # static unroll
            hit = hit | (codes_v[:, k:k + 1] == lane)
        slab = hit.astype(jnp.float32)                             # (R, KV)

        # ONE MXU matmul = embedding lookup + all filter sizes + whole batch.
        acc = jnp.dot(slab, p_ref[r_wcomb:r_wcomb + KV, 0:FT],
                      preferred_element_type=jnp.float32)          # (R, FT)

        # Constant additive mask (0 / -1e30) kills out-of-range timesteps per
        # filter group, then one sublane max-pool over time.
        masked = acc[0:N, :] + p_ref[r_mask:r_mask + N, 0:FT]      # (N, FT)
        pooled = jnp.max(masked.reshape(B, S, FT), axis=1)         # (B, FT)

        # max_t(relu(x_t + b)) == relu(max_t(x_t) + b): bias + ReLU post-pool.
        bias_blk = p_ref[r_bias:r_bias + 8, :]                     # (8, 128)
        h = jnp.maximum(pooled + bias_blk[0:1, 0:FT], 0.0)         # (B, FT)

        # Linear head; weight/bias lanes >= C are zero -> lane-dense store.
        logits = jnp.dot(h, p_ref[r_wlin:r_wlin + FT, :],
                         preferred_element_type=jnp.float32)       # (B, 128)
        out_ref[...] = logits + bias_blk[1:2, :]

    out = pl.pallas_call(
        kernel,
        out_shape=jax.ShapeDtypeStruct((B, LANES), jnp.float32),
        in_specs=[pl.BlockSpec(memory_space=pltpu.MemorySpace.VMEM)] * 2,
        out_specs=pl.BlockSpec(memory_space=pltpu.MemorySpace.VMEM),
    )(codes, packed)
    return out[:, :C]


def textcnn_ref(X, params):
    """Pure-JAX reference mirroring the PyTorch forward exactly."""
    emb = params['W_emb'][X]                                       # (B, S, E)
    pooled = []
    for i, fs in enumerate(filter_sizes):
        w = params['conv_w'][i][:, 0]                              # (F, fs, E)
        b = params['conv_b'][i]                                    # (F,)
        Tout = sequence_length - fs + 1
        outs = []
        for t in range(Tout):
            window = emb[:, t:t + fs, :]                           # (B, fs, E)
            outs.append(jnp.einsum('bke,fke->bf', window, w))
        h = jax.nn.relu(jnp.stack(outs, axis=1) + b)               # (B, Tout, F)
        pooled.append(jnp.max(h, axis=1))                          # (B, F)
    h_pool = jnp.concatenate(pooled, axis=1)                       # (B, 3F)
    return h_pool @ params['lin_w'].T + params['bias']


if __name__ == "__main__":
    key = jax.random.PRNGKey(0)
    keys = jax.random.split(key, 6)
    X = jax.random.randint(keys[0], (batch_size, sequence_length),
                           0, vocab_size, dtype=jnp.int32)
    params = {
        'W_emb': 0.1 * jax.random.normal(
            keys[1], (vocab_size, embedding_size), jnp.float32),
        'conv_w': [0.1 * jax.random.normal(
            keys[2 + i], (num_filters, 1, fs, embedding_size), jnp.float32)
            for i, fs in enumerate(filter_sizes)],
        'conv_b': [jnp.full((num_filters,), 0.01 * (i + 1), jnp.float32)
                   for i in range(len(filter_sizes))],
        'lin_w': 0.1 * jax.random.normal(
            keys[5], (num_classes, num_filters_total), jnp.float32),
        'bias': jnp.ones((num_classes,), jnp.float32),  # nn.Parameter(torch.ones)
    }

    out = textcnn_pallas(X, params)
    jax.block_until_ready(out)

    ref = textcnn_ref(X, params)
    assert out.shape == (batch_size, num_classes)
    assert jnp.allclose(out, ref, atol=1e-5, rtol=1e-5), (out, ref)
    print("KERNEL_OK")
</pallas_src>

<mosaic_0001>
module attributes {stable_mosaic.version = 11 : i64} {
  func.func @kernel(%arg0: memref<16x4xi32, #tpu.memory_space<vmem>>, %arg1: memref<112x128xf32, #tpu.memory_space<vmem>>, %arg2: memref<2x128xf32, #tpu.memory_space<vmem>>) attributes {dimension_semantics = [], scalar_prefetch = 0 : i64, scratch_operands = 0 : i64, tpu.core_type = #tpu.core_type<tc>} {
    %c0 = arith.constant 0 : index
    %c0_0 = arith.constant 0 : index
    %0 = vector.load %arg0[%c0, %c0_0] : memref<16x4xi32, #tpu.memory_space<vmem>>, vector<16x4xi32>
    %1 = tpu.iota {dimensions = array<i32: 1>} : vector<16x64xi32>
    %2 = vector.extract_strided_slice %0 {offsets = [0, 0], sizes = [16, 1], strides = [1, 1]} : vector<16x4xi32> to vector<16x1xi32>
    %3 = vector.broadcast %2 : vector<16x1xi32> to vector<16x64xi32>
    %4 = arith.cmpi eq, %3, %1 : vector<16x64xi32>
    %5 = vector.extract_strided_slice %0 {offsets = [0, 1], sizes = [16, 1], strides = [1, 1]} : vector<16x4xi32> to vector<16x1xi32>
    %6 = vector.broadcast %5 : vector<16x1xi32> to vector<16x64xi32>
    %7 = arith.cmpi eq, %6, %1 : vector<16x64xi32>
    %8 = arith.ori %4, %7 : vector<16x64xi1>
    %9 = vector.extract_strided_slice %0 {offsets = [0, 2], sizes = [16, 1], strides = [1, 1]} : vector<16x4xi32> to vector<16x1xi32>
    %10 = vector.broadcast %9 : vector<16x1xi32> to vector<16x64xi32>
    %11 = arith.cmpi eq, %10, %1 : vector<16x64xi32>
    %12 = arith.ori %8, %11 : vector<16x64xi1>
    %13 = vector.extract_strided_slice %0 {offsets = [0, 3], sizes = [16, 1], strides = [1, 1]} : vector<16x4xi32> to vector<16x1xi32>
    %14 = vector.broadcast %13 : vector<16x1xi32> to vector<16x64xi32>
    %15 = arith.cmpi eq, %14, %1 : vector<16x64xi32>
    %16 = arith.ori %12, %15 : vector<16x64xi1>
    %17 = arith.extui %16 : vector<16x64xi1> to vector<16x64xi32>
    %18 = arith.sitofp %17 : vector<16x64xi32> to vector<16x64xf32>
    %c0_1 = arith.constant 0 : index
    %c0_2 = arith.constant 0 : index
    %19 = vector.load %arg1[%c0_1, %c0_2] : memref<112x128xf32, #tpu.memory_space<vmem>>, vector<64x24xf32>
    %cst = arith.constant dense<0.000000e+00> : vector<16x24xf32>
    %20 = tpu.matmul %18, %19, %cst {dimension_numbers = #tpu.dot_dimension_numbers<[1], [0], [0], [1], [0, 0, 1, 1], [], []>} : vector<16x64xf32>, vector<64x24xf32>, vector<16x24xf32> -> vector<16x24xf32>
    %c64 = arith.constant 64 : index
    %c0_3 = arith.constant 0 : index
    %21 = vector.load %arg1[%c64, %c0_3] : memref<112x128xf32, #tpu.memory_space<vmem>>, vector<16x24xf32>
    %22 = arith.addf %20, %21 : vector<16x24xf32>
    %23 = vector.shape_cast %22 : vector<16x24xf32> to vector<2x8x24xf32>
    %cst_4 = arith.constant dense<0xFF800000> : vector<2x24xf32>
    %24 = vector.multi_reduction <maximumf>, %23, %cst_4 [1] : vector<2x8x24xf32> to vector<2x24xf32>
    %c80 = arith.constant 80 : index
    %c0_5 = arith.constant 0 : index
    %25 = vector.load %arg1[%c80, %c0_5] : memref<112x128xf32, #tpu.memory_space<vmem>>, vector<8x128xf32>
    %26 = vector.extract_strided_slice %25 {offsets = [0, 0], sizes = [1, 24], strides = [1, 1]} : vector<8x128xf32> to vector<1x24xf32>
    %27 = vector.broadcast %26 : vector<1x24xf32> to vector<2x24xf32>
    %28 = arith.addf %24, %27 : vector<2x24xf32>
    %cst_6 = arith.constant 0.000000e+00 : f32
    %29 = vector.broadcast %cst_6 : f32 to vector<2x24xf32>
    %30 = arith.maximumf %28, %29 : vector<2x24xf32>
    %c88 = arith.constant 88 : index
    %c0_7 = arith.constant 0 : index
    %31 = vector.load %arg1[%c88, %c0_7] : memref<112x128xf32, #tpu.memory_space<vmem>>, vector<24x128xf32>
    %cst_8 = arith.constant dense<0.000000e+00> : vector<2x128xf32>
    %32 = tpu.matmul %30, %31, %cst_8 {dimension_numbers = #tpu.dot_dimension_numbers<[1], [0], [0], [1], [0, 0, 1, 1], [], []>} : vector<2x24xf32>, vector<24x128xf32>, vector<2x128xf32> -> vector<2x128xf32>
    %33 = vector.extract_strided_slice %25 {offsets = [1, 0], sizes = [1, 128], strides = [1, 1]} : vector<8x128xf32> to vector<1x128xf32>
    %34 = vector.broadcast %33 : vector<1x128xf32> to vector<2x128xf32>
    %35 = arith.addf %32, %34 : vector<2x128xf32>
    %c0_9 = arith.constant 0 : index
    %c0_10 = arith.constant 0 : index
    %36 = vector.load %arg2[%c0_9, %c0_10] : memref<2x128xf32, #tpu.memory_space<vmem>>, vector<2x128xf32>
    tpu.vector_store %arg2[%c0_9, %c0_10], %35 {strides = array<i32>} : memref<2x128xf32, #tpu.memory_space<vmem>>, vector<2x128xf32>,
    return
  }
}

</mosaic_0001>

<bundles_post_ra>
// kernel: tpu_custom_call.1
= control target key start
LH: loop header
LB: loop body
LE: loop exit
PB: predicated region body
PF: predicated region fallthrough
CT: control target
= control target key end

     0   :  { %7 = vsyncpa [#allocation3], 0  ;;  %s480_s0 = inlined_call_operand.vmem [shape: s32[16,4], index: 0, kind: input, shape index: {}]   ;;  %s481_s1 = inlined_call_operand.hbm [shape: f32[112,128], index: 1, kind: input, shape index: {}]   ;;  %s482_s2 = inlined_call_operand.hbm [shape: f32[2,128], index: 2, kind: output, shape index: {}]  }
   0x1   :  { %8 = vsyncpa [#allocation4], 0  ;;  %s421_s9 = smov [#allocation2]   ;;  %s373_s13 = scalar_lea.hbm %s481_s1, 1792 }
   0x2   :  { %s16_s10 = sshll.u32 %s421_s9, 4  ;;  %p374_p0 = scmp.ne.s32.totalorder %s481_s1, %s373_s13  ;;  %s17_s10 = int_to_ptr.vmem [resolvable:$true] %s16_s10 }
   0x3   :  { %p377_p1 = scmp.lt.u32.totalorder %s373_s13, %s481_s1 }
   0x5   :  { %p379_p2 = pnand %p377_p1, %p374_p0 }
   0x7   :  { %382 = shalt.err (!%p379_p2)
}
   0x8   :  { %s383_s18 = scalar_lea.vmem %s17_s10, 1792  ;;  %p388_p4 = scmp.lt.s32.totalorder %s17_s10, %s17_s10 }
   0x9   :  { %p384_p3 = scmp.ne.s32.totalorder %s17_s10, %s383_s18  ;;  %p389_p5 = scmp.lt.s32.totalorder %s383_s18, %s383_s18 }
   0xb   :  { %p390_p6 = por %p389_p5, %p388_p4 }
   0xd   :  { %p391_p7 = pnand %p390_p6, %p384_p3 }
   0xf   :  { %394 = shalt.err (!%p391_p7)
}
  0x10   :  { %s422_s19 = smov 128   ;;  %s423_s20 = smov 8  }
  0x11   :  { %22 = dma.hbm_to_vmem [thread:$0]  %s481_s1, 1792, %s17_s10, [#allocation3], %s422_s19, %s422_s19, %s423_s20  }
  0x12   :  { %417 = dma.done.wait [#allocation3], 1792  }
  0x13   :  { %418 = vsyncadd [#allocation3], 4294965504  ;;  %v424_v0 = vmov 0   ;;  %v27_v1 = vld [vmem:[%s480_s0 + $0x8] sm:$0xff]  ;;  %v26_v2 = vld [vmem:[%s480_s0] sm:$0xff]  ;;  %v425_v5 = vmov 1   ;;  %v28_v20 = vlaneseq }
  0x14   :  { %367 = vset.pattern.permute.xlu1 %v424_v0  ;;  %365 = vset.pattern.permute.xlu0 %v424_v0  ;;  %v72_v3 = vld [vmem:[#allocation2] sm:$0xff]  ;;  %v73_v4 = vld [vmem:[#allocation2 + $0x8] sm:$0xff]  ;;  %v74_v7 = vld [vmem:[#allocation2 + $0x10] sm:$0xff]  ;;  %v426_v9 = vmov 2   ;;  %v427_v14 = vmov 3   ;;  %vm82_vm7 = vcmask 523264  }
  0x15   :  { %34 = vperm.xlu1 %367, %v27_v1   ;;  %31 = vperm.xlu0 %365, %v26_v2   ;;  %v335_v6 = vpack.c.bf16 %v73_v4, %v72_v3  ;;  %v75_v8 = vld [vmem:[#allocation2 + $0x18] sm:$0xff]  ;;  %v76_v11 = vld [vmem:[#allocation2 + $0x20] sm:$0xff]  ;;  %v77_v12 = vld [vmem:[#allocation2 + $0x28] sm:$0xff]  ;;  %v29_v22 = vand.u32 127, %v28_v20  ;;  %v428_v27 = vmov 0.0   ;;  %v429_v33 = vmov 0.0|0.0  }
  0x16   :  { %v339_v10 = vpack.c.bf16 %v75_v8, %v74_v7  ;;  %v343_v13 = vpack.c.bf16 %v77_v12, %v76_v11  ;;  %v78_v15 = vld [vmem:[#allocation2 + $0x30] sm:$0xff]  ;;  %v79_v16 = vld [vmem:[#allocation2 + $0x38] sm:$0xff]  ;;  %v189_v32 = vld [vmem:[#allocation2 + $0x60] sm:$0xff]  ;;  %351 = vmatprep.subr.bf16.mxu1 %v429_v33  ;;  %vm430_vm15 = vmmov 0   ;;  %v181_v36 = vshrl.u32 %v28_v20, 7  ;;  %s431_s0 = smov [#allocation5]  }
  0x17   :  { %336 = vmatprep.subr.bf16.mxu0 %v335_v6  ;;  %v347_v17 = vpack.c.bf16 %v79_v16, %v78_v15  ;;  %v188_v31 = vld [vmem:[#allocation2 + $0x58] sm:$0xff]  ;;  %332 = vmatprep.mubr.msk.f32.mxu1 %vm430_vm15, %v428_v27  ;;  %v190_v35 = vld [vmem:[#allocation2 + $0x68] sm:$0xff]  ;;  %v179_v38 = vld [vmem:[#allocation2 + $0x50] sm:$0xff]  ;;  %s279_s1 = sshll.u32 %s431_s0, 4  ;;  %s280_s1 = int_to_ptr.vmem [resolvable:$true] %s279_s1 }
  0x18   :  { %338 = vmatpush3.bf16.msra.mxu0 %v335_v6  ;;  %v352_v34 = vpack.c.bf16 %v189_v32, %v188_v31  ;;  %v193_v37 = vsub.s32 1, %v181_v36  ;;  %v81_v40 = vld [vmem:[#allocation2 + $0x48] sm:$0xff]  ;;  %v80_v41 = vld [vmem:[#allocation2 + $0x40] sm:$0xff]  ;;  %v182_v53 = vsub.s32 0, %v181_v36  ;;  %s395_s27 = scalar_lea.vmem %s280_s1, 32  ;;  %p400_p9 = scmp.lt.s32.totalorder %s280_s1, %s280_s1 }
  0x19   :  { %368 = vset.pattern.permute.xlu1 %v425_v5  ;;  %366 = vset.pattern.permute.xlu0 %v425_v5  ;;  %p396_p8 = scmp.ne.s32.totalorder %s280_s1, %s395_s27  ;;  %p401_p10 = scmp.lt.s32.totalorder %s395_s27, %s395_s27 }
  0x1a   :  { %42 = vperm.xlu1 %368, %v27_v1   ;;  %39 = vperm.xlu0 %366, %v26_v2   ;;  %v194_v39 = vrot.slane %v179_v38, %v193_v37  ;;  %v183_v58 = vrot.slane %v179_v38, %v182_v53 }
  0x1b   :  { %340 = vmatprep.subr.bf16.mxu0 %v339_v10  ;;  %353 = vmatpush3.bf16.msra.mxu1 %v352_v34  ;;  %p402_p11 = por %p401_p10, %p400_p9 }
  0x1c   :  { %342 = vmatpush3.bf16.msra.mxu0 %v339_v10  ;;  %330 = vmatprep.subr.mxu1 %v428_v27 }
  0x1d   :  { %344 = vmatprep.subr.bf16.mxu0 %v343_v13  ;;  %p403_p12 = pnand %p402_p11, %p396_p8 }
  0x1e   :  { %369 = vset.pattern.permute.xlu1 %v426_v9  ;;  %370 = vset.pattern.permute.xlu0 %v426_v9 }
  0x1f   :  { %49 = vperm.xlu1 %369, %v26_v2   ;;  %52 = vperm.xlu0 %370, %v27_v1  }
  0x20   :  { %346 = vmatpush3.bf16.msra.mxu0 %v343_v13  ;;  %331 = vmatpush3.msra.mxu1 %v190_v35 }
  0x21   :  { %348 = vmatprep.subr.bf16.mxu0 %v347_v17 }
  0x23   :  { %371 = vset.pattern.permute.xlu1 %v427_v14  ;;  %372 = vset.pattern.permute.xlu0 %v427_v14 }
  0x24   :  { %59 = vperm.xlu1 %371, %v26_v2   ;;  %350 = vmatpush3.bf16.msra.mxu0 %v347_v17 }
  0x28   :  { %62 = vperm.xlu1 %371, %v27_v1  }
  0x94   :  { %v35_v18 = vpop.permute.xlu1 %34  ;;  %v32_v19 = vpop.permute.xlu0 %31 }
  0x95   :  { %vm36_vm0 = vcmp.eq.s32.totalorder %v32_v19, %v29_v22  ;;  %vm37_vm10 = vcmp.eq.s32.totalorder %v35_v18, %v29_v22 }
  0x99   :  { %v43_v21 = vpop.permute.xlu1 %42  ;;  %v40_v23 = vpop.permute.xlu0 %39 }
  0x9a   :  { %vm44_vm1 = vcmp.eq.s32.totalorder %v40_v23, %v29_v22  ;;  %vm45_vm4 = vcmp.eq.s32.totalorder %v43_v21, %v29_v22 }
  0x9b   :  { %vm46_vm2 = vmor %vm36_vm0, %vm44_vm1  ;;  %vm164_vm0 = vcmask 195584   ;;  %vm198_vm1 = vcmask 1041409  }
  0x9c   :  { %vm47_vm11 = vmor %vm37_vm10, %vm45_vm4 }
  0x9e   :  { %v50_v24 = vpop.permute.xlu1 %49  ;;  %v53_v25 = vpop.permute.xlu0 %52 }
  0x9f   :  { %vm54_vm3 = vcmp.eq.s32.totalorder %v50_v24, %v29_v22  ;;  %vm55_vm8 = vcmp.eq.s32.totalorder %v53_v25, %v29_v22 }
  0xa0   :  { %vm56_vm5 = vmor %vm46_vm2, %vm54_vm3 }
  0xa1   :  { %vm57_vm12 = vmor %vm47_vm11, %vm55_vm8 }
  0xa3   :  { %v60_v26 = vpop.permute.xlu1 %59 }
  0xa4   :  { %vm64_vm6 = vcmp.eq.s32.totalorder %v60_v26, %v29_v22 }
  0xa5   :  { %vm66_vm9 = vmor %vm56_vm5, %vm64_vm6 }
  0xa6   :  { %v288_v28 = vsel %vm66_vm9, 1.0, %v428_v27 }
  0xa7   :  { %v63_v29 = vpop.permute.xlu1 %62  ;;  %323 = vmatprep.mubr.msk.f32.mxu0 %vm82_vm7, %v288_v28 }
  0xa8   :  { %vm65_vm13 = vcmp.eq.s32.totalorder %v63_v29, %v29_v22 }
  0xa9   :  { %vm67_vm14 = vmor %vm57_vm12, %vm65_vm13 }
  0xaa   :  { %v289_v30 = vsel %vm67_vm14, 1.0, %v428_v27 }
  0xab   :  { %324 = vmatmul.mubr.msk.f32.vlgmr.msra.gmra.mrb[0].mxu0 %vm82_vm7, %v289_v30 }
 0x17e   :  { %v325_v42 = vpop.f32.mrb[0].mxu0 }
 0x17f   :  { %v161_v43 = vadd.f32 %v325_v42, %v81_v40  ;;  %v155_v44 = vpop.f32.mrb[1].mxu0 }
 0x180   :  { %v156_v45 = vadd.f32 %v155_v44, %v80_v41 }
 0x181   :  { %v172_v46 = vsel %vm164_vm0, %v161_v43, -inf }
 0x182   :  { %v173_v47 = vrot.slane %v172_v46, 4  ;;  %v165_v48 = vsel %vm164_vm0, %v156_v45, -inf }
 0x183   :  { %v166_v49 = vrot.slane %v165_v48, 4 }
 0x184   :  { %v174_v50 = vmax.f32 %v172_v46, %v173_v47 }
 0x185   :  { %v167_v51 = vmax.f32 %v165_v48, %v166_v49 }
 0x186   :  { %v175_v52 = vrot.slane %v174_v50, 2 }
 0x187   :  { %v168_v54 = vrot.slane %v167_v51, 2 }
 0x188   :  { %v176_v55 = vmax.f32 %v174_v50, %v175_v52 }
 0x189   :  { %v169_v56 = vmax.f32 %v167_v51, %v168_v54 }
 0x18a   :  { %v177_v57 = vrot.slane %v176_v55, 1 }
 0x18b   :  { %v170_v59 = vrot.slane %v169_v56, 1 }
 0x18c   :  { %v178_v60 = vmax.f32 %v176_v55, %v177_v57 }
 0x18d   :  { %v171_v61 = vmax.f32 %v169_v56, %v170_v59 }
 0x18e   :  { %v185_v62 = vadd.f32 %v183_v58, %v178_v60 }
 0x18f   :  { %v184_v63 = vadd.f32 %v183_v58, %v171_v61 }
 0x190   :  { %v187_v0 = vmax.f32 %v185_v62, 0.0 }
 0x191   :  { %v186_v1 = vmax.f32 %v184_v63, 0.0 }
 0x192   :  { %v197_v2 = vrot.slane %v187_v0, 7 }
 0x194   :  { %v199_v3 = vsel %vm198_vm1, %v197_v2, %v186_v1 }
 0x195   :  { %333 = vmatmul.mubr.msk.f32.vlgmr.msra.gmra.mrb[0].mxu1 %vm164_vm0, %v199_v3 }
 0x268   :  { %v268_v4 = vpop.f32.mrb[0].mxu1 }
 0x269   :  { %v269_v5 = vadd.f32 %v268_v4, %v194_v39  ;;  %v334_v6 = vpop.f32.mrb[1].mxu1 }
 0x26b   :  { %272 = vst [vmem:[#allocation5] sm:$0x3] %v269_v5 }
 0x26c   :  { %406 = shalt.err (!%p403_p12)
}
 0x26d   :  { %s407_s30 = scalar_lea.hbm %s482_s2, 32 }
 0x26e   :  { %p408_p13 = scmp.ne.s32.totalorder %s482_s2, %s407_s30  ;;  %p411_p0 = scmp.lt.u32.totalorder %s407_s30, %s482_s2 }
 0x270   :  { %p413_p1 = pnand %p411_p0, %p408_p13 }
 0x272   :  { %416 = shalt.err (!%p413_p1)
}
 0x273   :  { %282 = dma.vmem_to_hbm [thread:$0]  %s280_s1, 32, %s482_s2, [#allocation4]  }
 0x274   :  { %419 = dma.done.wait [#allocation4], 32  }
 0x275   :  { %420 = vsyncadd [#allocation4], 4294967264 }
 0x276   :  { %286 = vsyncpa [#allocation3], 1 }
 0x277   :  { %287 = vsyncpa [#allocation4], 1 }

</bundles_post_ra>
